<compile_context>
chip_gen: v5e
topology: v5e:2x2
jax: 0.10.0
libtpu: 0.0.40
codegen_flags: <defaults>
</compile_context>

<pallas_src>
import functools

import jax
import jax.numpy as jnp
from jax.experimental import pallas as pl
from jax.experimental.pallas import tpu as pltpu


_LANES = 128
_SUBLANES = 8
_MAX_BLOCK_ROWS = 4096        # 4096 x 128 f32 = 2 MiB per block
_PALLAS_MIN_ELEMS = 8 * 1024  # below this, fused XLA beats the kernel launch cost


def _round_up(v, m):
    return ((v + m - 1) // m) * m


def _gamma_act_kernel(x_ref, o_ref, *, k_a, theta_a, k_b, theta_b):
    """out = a * tanh(0.5*x) + b on a lane-dense (tm, 128) tile.

    Even lanes carry k logits, odd lanes carry theta logits.  The per-lane
    constants a, b live on a single (1, 128) row and broadcast along sublanes.
    """
    lane = jax.lax.broadcasted_iota(jnp.int32, (1, _LANES), dimension=1)
    is_k = (lane & 1) == 0
    a = jnp.where(is_k, k_a, theta_a).astype(x_ref.dtype)   # (1, 128)
    b = jnp.where(is_k, k_b, theta_b).astype(x_ref.dtype)   # (1, 128)
    x = x_ref[...]
    # (max-min)*sigmoid(x) + min  ==  0.5*(max-min)*tanh(0.5*x) + 0.5*(max+min)
    o_ref[...] = a * jnp.tanh(0.5 * x) + b


def _reference(x, min_k, max_k, min_theta, max_theta):
    sig = jax.nn.sigmoid(x)
    x_k = (max_k - min_k) * sig[:, 0] + min_k
    x_theta = (max_theta - min_theta) * sig[:, 1] + min_theta
    return jnp.stack((x_k, x_theta), axis=1)


@functools.partial(
    jax.jit, static_argnames=("min_k", "max_k", "min_theta", "max_theta")
)
def gamma_parameter_activation(x, *, min_k, max_k, min_theta, max_theta):
    """x: (N, 2) float32 -> (N, 2); col 0 in [min_k, max_k], col 1 in [min_theta, max_theta]."""
    assert x.ndim == 2 and x.shape[1] == 2, "expects an Nx2 input"
    n = x.shape[0]
    total = 2 * n

    # Tiny / empty inputs: fixed pallas_call launch + DMA setup dominates, use
    # the fused XLA path (also handles N == 0 cleanly).
    if total < _PALLAS_MIN_ELEMS:
        return _reference(x, min_k, max_k, min_theta, max_theta)

    # Free view: row-major (N, 2) -> (2N,).  Pad only to a lane multiple
    # (<= 127 elements, fires only when N % 64 != 0); the row count does NOT
    # need to be a multiple of the block rows -- Pallas masks the partial
    # trailing grid block.
    flat = x.reshape(-1)
    pad = (-total) % _LANES
    if pad:
        flat = jnp.pad(flat, (0, pad))
    rows = flat.shape[0] // _LANES          # >= 64 on this path
    x2 = flat.reshape(rows, _LANES)

    # Block rows: multiple of 8, capped at 2 MiB/block, and chosen so the grid
    # has >= 2 steps whenever possible (lets v7x shard the parallel axis
    # across both TensorCores).
    tm = min(_MAX_BLOCK_ROWS, _round_up(pl.cdiv(rows, 2), _SUBLANES))
    grid = (pl.cdiv(rows, tm),)

    kernel = functools.partial(
        _gamma_act_kernel,
        k_a=0.5 * float(max_k - min_k),
        theta_a=0.5 * float(max_theta - min_theta),
        k_b=0.5 * float(max_k + min_k),
        theta_b=0.5 * float(max_theta + min_theta),
    )

    out2 = pl.pallas_call(
        kernel,
        out_shape=jax.ShapeDtypeStruct((rows, _LANES), x.dtype),
        grid=grid,
        in_specs=[pl.BlockSpec((tm, _LANES), lambda i: (i, 0))],
        out_specs=pl.BlockSpec((tm, _LANES), lambda i: (i, 0)),
        compiler_params=pltpu.CompilerParams(
            dimension_semantics=("parallel",),
        ),
        # When we had to pad, x2 is a kernel-private buffer: alias it into the
        # output to drop the separate output allocation.  Never alias the
        # caller's live x (unpadded branch).
        input_output_aliases=({0: 0} if pad else {}),
    )(x2)

    out_flat = out2.reshape(-1)
    if pad:
        out_flat = out_flat[:total]
    return out_flat.reshape(n, 2)


if __name__ == "__main__":
    # Module hyper-parameters (deterministic, set in-script).
    min_k, max_k = 0.5, 5.0
    min_theta, max_theta = 0.1, 2.0

    key = jax.random.PRNGKey(0)

    # n = 4096: aligned Pallas path (no pad, pure reshape views).
    # n = 4100: unaligned Pallas path (lane pad + masked partial last block).
    # n = 8:    tiny-input XLA fallback path.
    for n in (4096, 4100, 8):
        x = jax.random.normal(jax.random.fold_in(key, n), (n, 2), dtype=jnp.float32)
        y = gamma_parameter_activation(
            x, min_k=min_k, max_k=max_k, min_theta=min_theta, max_theta=max_theta
        )
        y = jax.block_until_ready(y)

        y_ref = _reference(x, min_k, max_k, min_theta, max_theta)
        assert y.shape == (n, 2)
        assert jnp.allclose(y, y_ref, atol=1e-5, rtol=1e-5), f"mismatch vs reference (n={n})"

    print("KERNEL_OK")
</pallas_src>

<mosaic_0001>
module attributes {stable_mosaic.version = 11 : i64} {
  func.func @_gamma_act_kernel(%arg0: i32, %arg1: memref<32x128xf32, #tpu.memory_space<vmem>>, %arg2: memref<32x128xf32, #tpu.memory_space<vmem>>) attributes {dimension_semantics = [#tpu.dimension_semantics<parallel>], iteration_bounds = array<i64: 2>, scalar_prefetch = 0 : i64, scratch_operands = 0 : i64, tpu.core_type = #tpu.core_type<tc>, window_params = [{transform_indices = @transform_0, window_bounds = array<i64: 32, 128>}, {transform_indices = @transform_1, window_bounds = array<i64: 32, 128>}]} {
    %0 = tpu.iota {dimensions = array<i32: 1>} : vector<1x128xi32>
    %c1_i32 = arith.constant 1 : i32
    %1 = vector.broadcast %c1_i32 : i32 to vector<1x128xi32>
    %2 = arith.andi %0, %1 : vector<1x128xi32>
    %c0_i32 = arith.constant 0 : i32
    %3 = vector.broadcast %c0_i32 : i32 to vector<1x128xi32>
    %4 = arith.cmpi eq, %2, %3 : vector<1x128xi32>
    %cst = arith.constant 2.250000e+00 : f32
    %cst_0 = arith.constant 0.949999988 : f32
    %5 = vector.broadcast %cst : f32 to vector<1x128xf32>
    %6 = vector.broadcast %cst_0 : f32 to vector<1x128xf32>
    %7 = arith.select %4, %5, %6 : vector<1x128xi1>, vector<1x128xf32>
    %cst_1 = arith.constant 2.750000e+00 : f32
    %cst_2 = arith.constant 1.050000e+00 : f32
    %8 = vector.broadcast %cst_1 : f32 to vector<1x128xf32>
    %9 = vector.broadcast %cst_2 : f32 to vector<1x128xf32>
    %10 = arith.select %4, %8, %9 : vector<1x128xi1>, vector<1x128xf32>
    %c0 = arith.constant 0 : index
    %c0_3 = arith.constant 0 : index
    %11 = vector.load %arg1[%c0, %c0_3] : memref<32x128xf32, #tpu.memory_space<vmem>>, vector<32x128xf32>
    %cst_4 = arith.constant 5.000000e-01 : f32
    %12 = vector.broadcast %cst_4 : f32 to vector<32x128xf32>
    %13 = arith.mulf %12, %11 : vector<32x128xf32>
    %14 = math.tanh %13 : vector<32x128xf32>
    %15 = vector.broadcast %7 : vector<1x128xf32> to vector<32x128xf32>
    %16 = arith.mulf %15, %14 : vector<32x128xf32>
    %17 = vector.broadcast %10 : vector<1x128xf32> to vector<32x128xf32>
    %18 = arith.addf %16, %17 : vector<32x128xf32>
    %c0_5 = arith.constant 0 : index
    %c0_6 = arith.constant 0 : index
    %19 = vector.load %arg2[%c0_5, %c0_6] : memref<32x128xf32, #tpu.memory_space<vmem>>, vector<32x128xf32>
    tpu.vector_store %arg2[%c0_5, %c0_6], %18 {strides = array<i32>} : memref<32x128xf32, #tpu.memory_space<vmem>>, vector<32x128xf32>,
    return
  }
  func.func @transform_0(%arg0: i32) -> (i32, i32) {
    %c0_i32 = arith.constant 0 : i32
    %c0_i32_0 = arith.constant 0 : i32
    return %arg0, %c0_i32 : i32, i32
  }
  func.func @transform_1(%arg0: i32) -> (i32, i32) {
    %c0_i32 = arith.constant 0 : i32
    %c0_i32_0 = arith.constant 0 : i32
    return %arg0, %c0_i32 : i32, i32
  }
}

</mosaic_0001>

<bundles_post_ra>
// kernel: gamma_parameter_activation.1
= control target key start
LH: loop header
LB: loop body
LE: loop exit
PB: predicated region body
PF: predicated region fallthrough
CT: control target
= control target key end

     0   :  { %s255_s6 = smov 0   ;;  %s272_s0 = inlined_call_operand.vmem [shape: f32[64,128], index: 0, kind: input, shape index: {}]   ;;  %s273_s1 = inlined_call_operand.vmem [shape: f32[64,128], index: 1, kind: output, shape index: {}]  }
   0x1 LB: > { %s206_s7 = sadd.s32 4294967295, %s241_s6   ;;  %p210_p0 = scmp.ge.s32.totalorder %s241_s6, 1  ;;  %s241_s6 = sphi %s255_s6, %s11_s6  }
   0x2   : > { %p88_p1 = scmp.lt.s32.totalorder %s241_s6, 3 }
   0x4   : > { %p89_p2 = pnand %p210_p0, %p88_p1 }
   0x5   : > { %s211_s8 = sshll.u32 (!%p89_p2), %s206_s7, 2 }
   0x6   : > { %92 = sbr.rel (%p89_p2) target bundleno = 32 (0x20), region = 24  ;;  %p109_p3 = scmp.lt.s32.totalorder (!%p89_p2), %s211_s8, 7 }
   0xb   : > { %v120_v0 = vlaneseq  ;;  %s275_s8 = smov (!%p109_p3, %s211_s8), 7  ;;  %v243_v11 = vmov 0.95   ;;  %v244_v14 = vmov 1.05  }
   0xc   : > { %s212_s9 = sshll.u32 %s275_s8, 3 }
   0xd   : > { %v121_v1 = vand.u32 127, %v120_v0  ;;  %s112_s12 = scalar_lea.vmem %s272_s0, %s212_s9  ;;  %s118_s15 = scalar_lea.vmem %s273_s1, %s212_s9 }
   0xe   : > { %v126_v3 = vld [vmem:[%s112_s12] sm:$0xff]  ;;  %v127_v4 = vld [vmem:[%s112_s12 + $0x8] sm:$0xff]  ;;  %v128_v5 = vld [vmem:[%s112_s12 + $0x10] sm:$0xff] }
   0xf   : > { %v122_v2 = vand.u32 1, %v121_v1  ;;  %v129_v6 = vld [vmem:[%s112_s12 + $0x18] sm:$0xff]  ;;  %v130_v7 = vmul.f32 0.5, %v126_v3  ;;  %v131_v8 = vmul.f32 0.5, %v127_v4  ;;  %v132_v9 = vmul.f32 0.5, %v128_v5 }
  0x10   : > { %v133_v10 = vmul.f32 0.5, %v129_v6 }
  0x11   : > { %227 = vtanh.f32 %v130_v7  ;;  %vm123_vm0 = vcmp.eq.s32.totalorder %v122_v2, 0 }
  0x12   : > { %229 = vtanh.f32 %v131_v8  ;;  %v124_v12 = vsel %vm123_vm0, 2.25, %v243_v11  ;;  %v125_v15 = vsel %vm123_vm0, 2.75, %v244_v14 }
  0x13   : > { %231 = vtanh.f32 %v132_v9 }
  0x14   : > { %233 = vtanh.f32 %v133_v10 }
  0x17   : > { %v228_v13 = vpop.eup %227 }
  0x18   : > { %v230_v16 = vpop.eup %229  ;;  %v138_v17 = vmul.f32 %v228_v13, %v124_v12 }
  0x19   : > { %v232_v18 = vpop.eup %231  ;;  %v139_v19 = vmul.f32 %v230_v16, %v124_v12 }
  0x1a   : > { %v234_v20 = vpop.eup %233  ;;  %v142_v21 = vadd.f32 %v138_v17, %v125_v15  ;;  %v140_v22 = vmul.f32 %v232_v18, %v124_v12 }
  0x1b   : > { %v143_v23 = vadd.f32 %v139_v19, %v125_v15  ;;  %v141_v24 = vmul.f32 %v234_v20, %v124_v12 }
  0x1c   : > { %146 = vst [vmem:[%s118_s15] sm:$0xff] %v142_v21  ;;  %v144_v25 = vadd.f32 %v140_v22, %v125_v15 }
  0x1d   : > { %147 = vst [vmem:[%s118_s15 + $0x8] sm:$0xff] %v143_v23  ;;  %v145_v26 = vadd.f32 %v141_v24, %v125_v15 }
  0x1e   : > { %148 = vst [vmem:[%s118_s15 + $0x10] sm:$0xff] %v144_v25 }
  0x1f   : > { %149 = vst [vmem:[%s118_s15 + $0x18] sm:$0xff] %v145_v26 }
  0x20 PF: > { %s11_s6 = sadd.s32 1, %s241_s6  }
  0x21   : > { %p8_p4 = scmp.ge.s32.totalorder %s11_s6, 4  }
  0x23   :  { %10 = sbr.rel (!%p8_p4) target bundleno = 1 (0x1), region = 54 }

</bundles_post_ra>
